<compile_context>
chip_gen: v7x
topology: tpu7x:2x2x1
jax: 0.10.0
libtpu: 0.0.40
codegen_flags: <defaults>
</compile_context>

<pallas_src>
import functools

import jax
import jax.numpy as jnp
from jax.experimental import pallas as pl
from jax.experimental.pallas import tpu as pltpu

LANES = 128           # lane width of the blocked layout / triangular constant
MAX_CHUNK_ROWS = 512  # rows (of LANES pixels each) per grid step (>= 64K px)


def _round_up(a, b):
    return -(-a // b) * b


# ------------------------------ Lovasz kernel -------------------------------
def lovasz_kernel(gts_ref, e_ref, g_ref, u_ref, out_ref, carry_ref):
    c = pl.program_id(0)

    @pl.when(c == 0)
    def _():
        out_ref[...] = jnp.zeros_like(out_ref)      # loss accumulator
        carry_ref[...] = jnp.zeros_like(carry_ref)  # running cumsum of labels

    e = e_ref[...]   # (CR, L) f32 sorted errors (desc, flat row-major), -inf padded
    g = g_ref[...]   # (CR, L) bf16 0/1 permuted labels, 0 padded
    u = u_ref[...]   # (L, L)  bf16 inclusive upper-triangular: u[j, i] = 1 if j <= i

    cr, l = e.shape
    gts = gts_ref[0].astype(jnp.float32)   # total positives (sort-invariant, from wrapper)
    cum_before = carry_ref[...]            # (1, 1) labels seen before this chunk

    row = jax.lax.broadcasted_iota(jnp.int32, (cr, l), 0)
    col = jax.lax.broadcasted_iota(jnp.int32, (cr, l), 1)
    prev_count = (c * (cr * l)).astype(jnp.float32)                # pixels before this chunk
    counts = prev_count + (row * l + col + 1).astype(jnp.float32)  # 1-based global position

    # ---- level 1: per-row inclusive cumsum of g on the MXU (bf16 exact for 0/1)
    within = jnp.dot(g, u, preferred_element_type=jnp.float32)     # (CR, L)

    # ---- level 2: exclusive prefix over the CR row sums.  The matmul's last
    # lane already holds each row's inclusive sum -> no cross-lane reduction.
    rs = within[:, l - 1:l]                                        # (CR, 1)
    rs_b = jnp.broadcast_to(rs, (cr, l))
    scan = rs_b
    off = 1
    while off < cr:                    # static unroll: ceil(log2(CR)) sublane rolls
        shifted = pltpu.roll(scan, off, axis=0)                    # [i] <- scan[i - off]
        scan = scan + jnp.where(row >= off, shifted, 0.0)
        off *= 2
    prefix = scan - rs_b                                           # exclusive row prefix

    cum_g = within + prefix + cum_before   # inclusive global cumsum of sorted labels

    # ---- jaccard -------------------------------------------------------------
    intersection = gts - cum_g
    union = gts + counts - cum_g                                   # always >= 1
    # EUP approx reciprocal + one Newton step (~1e-7 rel err) instead of a VALU divide.
    recip = pl.reciprocal(union, approx=True)
    recip = recip * (2.0 - union * recip)
    jaccard = 1.0 - intersection * recip

    # ---- grad = flat first difference of jaccard (XLU rolls) ------------------
    prev_lane = pltpu.roll(jaccard, 1, axis=1)    # [r, c] <- jaccard[r, c-1]
    prev_row = pltpu.roll(prev_lane, 1, axis=0)   # at c == 0: jaccard[r-1, L-1]
    prev = jnp.where(col == 0, prev_row, prev_lane)
    # Chunk-boundary value jaccard[prev_count - 1], recomputed from the carried
    # cumsum (jaccard[-1] := 0 for the very first chunk).
    prev_union = jnp.maximum(gts + prev_count - cum_before, 1.0)
    prev_jac = 1.0 - (gts - cum_before) / prev_union               # (1, 1)
    boundary = jnp.where(c == 0, 0.0, prev_jac)
    prev = jnp.where((row == 0) & (col == 0), boundary, prev)
    grad = jaccard - prev

    # ---- weight = F.elu(e) + 1; padded lanes carry e = -inf so exp(e) = 0 ------
    weight = jnp.where(e > 0.0, e + 1.0, jnp.exp(e))

    out_ref[...] = out_ref[...] + jnp.sum(weight * grad)
    carry_ref[...] = cum_before + jnp.sum(rs)


# --------------------------------- Wrapper ----------------------------------
@functools.partial(jax.jit, static_argnames=("ignore_index",))
def lovasz_loss(logits, labels, ignore_index=None):
    if ignore_index is not None:
        # TODO(synk): boolean masking with `ignore_index` yields data-dependent
        # shapes; not supported in this static-shape kernel.
        raise NotImplementedError("ignore_index is not supported")

    x = logits.reshape(-1).astype(jnp.float32)
    y = labels.reshape(-1).astype(jnp.float32)
    p = x.shape[0]

    # Hinge errors in plain JAX -> fused by XLA into the sort-key computation.
    errors = 1.0 - x * (2.0 * y - 1.0)

    # Chunked (rows, LANES) layout: rows = n_chunks * chunk_rows, chunk_rows a
    # multiple of 16 (bf16 tile alignment).
    rows_needed = max(_round_up(-(-p // LANES), 16), 16)
    n_chunks = -(-rows_needed // MAX_CHUNK_ROWS)
    chunk_rows = _round_up(-(-rows_needed // n_chunks), 16)
    rows = n_chunks * chunk_rows
    pad = rows * LANES - p

    # Pad BEFORE the sort: -inf error keys land at the tail of the descending
    # order and exp(-inf) = 0 zeroes the padded weights; padded labels are 0.
    errors = jnp.pad(errors, (0, pad), constant_values=-jnp.inf)
    y_pad = jnp.pad(y, (0, pad))

    # Descending sort with labels carried as payload (single XLA sort, no gathers).
    neg_sorted, g_sorted = jax.lax.sort_key_val(-errors, y_pad)
    e2d = (-neg_sorted).reshape(rows, LANES)
    g2d = g_sorted.astype(jnp.bfloat16).reshape(rows, LANES)   # 0/1 exact in bf16

    # Total positives (sort-invariant) as an int32 scalar-prefetch operand.
    # Note: cumsum carried in f32 -> exact up to 2^24 positives (same limit as
    # the float reference implementation).
    gts = jnp.sum(y).astype(jnp.int32).reshape(1)

    # Fixed 128x128 inclusive upper-triangular constant (bf16, 32 KiB).
    idx = jnp.arange(LANES, dtype=jnp.int32)
    upper = (idx[:, None] <= idx[None, :]).astype(jnp.bfloat16)

    loss = pl.pallas_call(
        lovasz_kernel,
        out_shape=jax.ShapeDtypeStruct((1, 1), jnp.float32),
        grid_spec=pltpu.PrefetchScalarGridSpec(
            num_scalar_prefetch=1,
            grid=(n_chunks,),
            in_specs=[
                pl.BlockSpec((chunk_rows, LANES), lambda c, gts: (c, 0)),
                pl.BlockSpec((chunk_rows, LANES), lambda c, gts: (c, 0)),
                pl.BlockSpec((LANES, LANES), lambda c, gts: (0, 0)),
            ],
            out_specs=pl.BlockSpec((1, 1), lambda c, gts: (0, 0)),
            scratch_shapes=[pltpu.VMEM((1, 1), jnp.float32)],
        ),
        compiler_params=pltpu.CompilerParams(
            dimension_semantics=("arbitrary",),
        ),
    )(gts, e2d, g2d, upper)
    return loss[0, 0]


# ----------------------------- Pure-JAX reference ----------------------------
def lovasz_loss_ref(logits, labels):
    x = logits.reshape(-1).astype(jnp.float32)
    y = labels.reshape(-1).astype(jnp.float32)
    errors = 1.0 - x * (2.0 * y - 1.0)
    perm = jnp.argsort(-errors)
    es = errors[perm]
    gs = y[perm]
    gts = gs.sum()
    inter = gts - jnp.cumsum(gs)
    union = gts + jnp.cumsum(1.0 - gs)
    jac = 1.0 - inter / union
    jac = jnp.concatenate([jac[:1], jac[1:] - jac[:-1]])
    elu = jnp.where(es > 0.0, es, jnp.exp(es) - 1.0)
    return jnp.dot(elu + 1.0, jac)


if __name__ == "__main__":
    key = jax.random.PRNGKey(0)
    k1, k2, k3, k4 = jax.random.split(key, 4)

    # Small synthetic segmentation-style inputs: [batch=2, H=16, W=16]
    logits = jax.random.normal(k1, (2, 16, 16), dtype=jnp.float32)
    labels = (jax.random.uniform(k2, (2, 16, 16)) > 0.5).astype(jnp.float32)

    loss = jax.block_until_ready(lovasz_loss(logits, labels))
    ref = jax.block_until_ready(lovasz_loss_ref(logits, labels))
    assert jnp.allclose(loss, ref, rtol=1e-4, atol=1e-4), (loss, ref)

    # Secondary check that exercises the multi-chunk (grid > 1) carry path.
    logits2 = jax.random.normal(k3, (2, 200, 200), dtype=jnp.float32)
    labels2 = (jax.random.uniform(k4, (2, 200, 200)) > 0.5).astype(jnp.float32)
    loss2 = jax.block_until_ready(lovasz_loss(logits2, labels2))
    ref2 = jax.block_until_ready(lovasz_loss_ref(logits2, labels2))
    assert jnp.allclose(loss2, ref2, rtol=1e-4, atol=1e-4), (loss2, ref2)

    print("KERNEL_OK")
</pallas_src>

<mosaic_0001>
module attributes {stable_mosaic.version = 11 : i64} {
  func.func @lovasz_kernel(%arg0: i32, %arg1: memref<1xi32, #tpu.memory_space<smem>>, %arg2: memref<16x128xf32, #tpu.memory_space<vmem>>, %arg3: memref<16x128xbf16, #tpu.memory_space<vmem>>, %arg4: memref<128x128xbf16, #tpu.memory_space<vmem>>, %arg5: memref<1x1xf32, #tpu.memory_space<vmem>>, %arg6: memref<1x1xf32, #tpu.memory_space<vmem>>) attributes {dimension_semantics = [#tpu.dimension_semantics<arbitrary>], iteration_bounds = array<i64: 1>, scalar_prefetch = 1 : i64, scratch_operands = 1 : i64, tpu.core_type = #tpu.core_type<tc>, window_params = [{transform_indices = @transform_0, window_bounds = array<i64: 16, 128>}, {transform_indices = @transform_1, window_bounds = array<i64: 16, 128>}, {pipeline_mode = #tpu.pipeline_mode<synchronous>, transform_indices = @transform_2, window_bounds = array<i64: 128, 128>}, {pipeline_mode = #tpu.pipeline_mode<synchronous>, transform_indices = @transform_3, window_bounds = array<i64: 1, 1>}]} {
    %c0_i32 = arith.constant 0 : i32
    %0 = arith.cmpi eq, %arg0, %c0_i32 : i32
    %1 = arith.extui %0 : i1 to i32
    %c0_i32_0 = arith.constant 0 : i32
    %2 = arith.cmpi ne, %1, %c0_i32_0 : i32
    scf.if %2 {
      %cst_39 = arith.constant 0.000000e+00 : f32
      %115 = vector.broadcast %cst_39 : f32 to vector<1x1xf32>
      %c0_40 = arith.constant 0 : index
      %c0_41 = arith.constant 0 : index
      %116 = vector.load %arg5[%c0_40, %c0_41] : memref<1x1xf32, #tpu.memory_space<vmem>>, vector<1x1xf32>
      tpu.vector_store %arg5[%c0_40, %c0_41], %115 {strides = array<i32>} : memref<1x1xf32, #tpu.memory_space<vmem>>, vector<1x1xf32>,
      %cst_42 = arith.constant 0.000000e+00 : f32
      %117 = vector.broadcast %cst_42 : f32 to vector<1x1xf32>
      %c0_43 = arith.constant 0 : index
      %c0_44 = arith.constant 0 : index
      %118 = vector.load %arg6[%c0_43, %c0_44] : memref<1x1xf32, #tpu.memory_space<vmem>>, vector<1x1xf32>
      tpu.vector_store %arg6[%c0_43, %c0_44], %117 {strides = array<i32>} : memref<1x1xf32, #tpu.memory_space<vmem>>, vector<1x1xf32>,
    } else {
    }
    %c0 = arith.constant 0 : index
    %c0_1 = arith.constant 0 : index
    %3 = vector.load %arg2[%c0, %c0_1] : memref<16x128xf32, #tpu.memory_space<vmem>>, vector<16x128xf32>
    %c0_2 = arith.constant 0 : index
    %c0_3 = arith.constant 0 : index
    %4 = vector.load %arg3[%c0_2, %c0_3] : memref<16x128xbf16, #tpu.memory_space<vmem>>, vector<16x128xbf16>
    %c0_4 = arith.constant 0 : index
    %c0_5 = arith.constant 0 : index
    %5 = vector.load %arg4[%c0_4, %c0_5] : memref<128x128xbf16, #tpu.memory_space<vmem>>, vector<128x128xbf16>
    %c0_6 = arith.constant 0 : index
    %6 = memref.load %arg1[%c0_6] : memref<1xi32, #tpu.memory_space<smem>>
    %7 = arith.sitofp %6 : i32 to f32
    %c0_7 = arith.constant 0 : index
    %c0_8 = arith.constant 0 : index
    %8 = vector.load %arg6[%c0_7, %c0_8] : memref<1x1xf32, #tpu.memory_space<vmem>>, vector<1x1xf32>
    %9 = tpu.iota {dimensions = array<i32: 0>} : vector<16x128xi32>
    %10 = tpu.iota {dimensions = array<i32: 1>} : vector<16x128xi32>
    %c2048_i32 = arith.constant 2048 : i32
    %11 = arith.muli %arg0, %c2048_i32 : i32
    %12 = arith.sitofp %11 : i32 to f32
    %c128_i32 = arith.constant 128 : i32
    %13 = vector.broadcast %c128_i32 : i32 to vector<16x128xi32>
    %14 = arith.muli %9, %13 : vector<16x128xi32>
    %15 = arith.addi %14, %10 : vector<16x128xi32>
    %c1_i32 = arith.constant 1 : i32
    %16 = vector.broadcast %c1_i32 : i32 to vector<16x128xi32>
    %17 = arith.addi %15, %16 : vector<16x128xi32>
    %18 = arith.sitofp %17 : vector<16x128xi32> to vector<16x128xf32>
    %19 = vector.broadcast %12 : f32 to vector<16x128xf32>
    %20 = arith.addf %19, %18 : vector<16x128xf32>
    %cst = arith.constant dense<0.000000e+00> : vector<16x128xf32>
    %21 = tpu.matmul %4, %5, %cst {dimension_numbers = #tpu.dot_dimension_numbers<[1], [0], [0], [1], [0, 0, 1, 1], [], []>} : vector<16x128xbf16>, vector<128x128xbf16>, vector<16x128xf32> -> vector<16x128xf32>
    %22 = vector.extract_strided_slice %21 {offsets = [0, 127], sizes = [16, 1], strides = [1, 1]} : vector<16x128xf32> to vector<16x1xf32>
    %23 = vector.shape_cast %22 : vector<16x1xf32> to vector<16x1xf32>
    %24 = vector.broadcast %23 : vector<16x1xf32> to vector<16x128xf32>
    %c1_i32_9 = arith.constant 1 : i32
    %25 = tpu.dynamic_rotate %24 by %c1_i32_9 dim 0 : vector<16x128xf32>, i32 -> vector<16x128xf32>
    %c1_i32_10 = arith.constant 1 : i32
    %26 = vector.broadcast %c1_i32_10 : i32 to vector<16x128xi32>
    %27 = arith.cmpi sge, %9, %26 : vector<16x128xi32>
    %cst_11 = arith.constant 0.000000e+00 : f32
    %28 = vector.broadcast %cst_11 : f32 to vector<16x128xf32>
    %29 = arith.select %27, %25, %28 : vector<16x128xi1>, vector<16x128xf32>
    %30 = arith.addf %24, %29 : vector<16x128xf32>
    %c2_i32 = arith.constant 2 : i32
    %31 = tpu.dynamic_rotate %30 by %c2_i32 dim 0 : vector<16x128xf32>, i32 -> vector<16x128xf32>
    %c2_i32_12 = arith.constant 2 : i32
    %32 = vector.broadcast %c2_i32_12 : i32 to vector<16x128xi32>
    %33 = arith.cmpi sge, %9, %32 : vector<16x128xi32>
    %cst_13 = arith.constant 0.000000e+00 : f32
    %34 = vector.broadcast %cst_13 : f32 to vector<16x128xf32>
    %35 = arith.select %33, %31, %34 : vector<16x128xi1>, vector<16x128xf32>
    %36 = arith.addf %30, %35 : vector<16x128xf32>
    %c4_i32 = arith.constant 4 : i32
    %37 = tpu.dynamic_rotate %36 by %c4_i32 dim 0 : vector<16x128xf32>, i32 -> vector<16x128xf32>
    %c4_i32_14 = arith.constant 4 : i32
    %38 = vector.broadcast %c4_i32_14 : i32 to vector<16x128xi32>
    %39 = arith.cmpi sge, %9, %38 : vector<16x128xi32>
    %cst_15 = arith.constant 0.000000e+00 : f32
    %40 = vector.broadcast %cst_15 : f32 to vector<16x128xf32>
    %41 = arith.select %39, %37, %40 : vector<16x128xi1>, vector<16x128xf32>
    %42 = arith.addf %36, %41 : vector<16x128xf32>
    %c8_i32 = arith.constant 8 : i32
    %43 = tpu.dynamic_rotate %42 by %c8_i32 dim 0 : vector<16x128xf32>, i32 -> vector<16x128xf32>
    %c8_i32_16 = arith.constant 8 : i32
    %44 = vector.broadcast %c8_i32_16 : i32 to vector<16x128xi32>
    %45 = arith.cmpi sge, %9, %44 : vector<16x128xi32>
    %cst_17 = arith.constant 0.000000e+00 : f32
    %46 = vector.broadcast %cst_17 : f32 to vector<16x128xf32>
    %47 = arith.select %45, %43, %46 : vector<16x128xi1>, vector<16x128xf32>
    %48 = arith.addf %42, %47 : vector<16x128xf32>
    %49 = arith.subf %48, %24 : vector<16x128xf32>
    %50 = arith.addf %21, %49 : vector<16x128xf32>
    %51 = vector.broadcast %8 : vector<1x1xf32> to vector<16x128xf32>
    %52 = arith.addf %50, %51 : vector<16x128xf32>
    %53 = vector.broadcast %7 : f32 to vector<16x128xf32>
    %54 = arith.subf %53, %52 : vector<16x128xf32>
    %55 = vector.broadcast %7 : f32 to vector<16x128xf32>
    %56 = arith.addf %55, %20 : vector<16x128xf32>
    %57 = arith.subf %56, %52 : vector<16x128xf32>
    %58 = tpu.reciprocal %57 {approx = true} : vector<16x128xf32> -> vector<16x128xf32>
    %59 = arith.mulf %57, %58 : vector<16x128xf32>
    %cst_18 = arith.constant 2.000000e+00 : f32
    %60 = vector.broadcast %cst_18 : f32 to vector<16x128xf32>
    %61 = arith.subf %60, %59 : vector<16x128xf32>
    %62 = arith.mulf %58, %61 : vector<16x128xf32>
    %63 = arith.mulf %54, %62 : vector<16x128xf32>
    %cst_19 = arith.constant 1.000000e+00 : f32
    %64 = vector.broadcast %cst_19 : f32 to vector<16x128xf32>
    %65 = arith.subf %64, %63 : vector<16x128xf32>
    %c1_i32_20 = arith.constant 1 : i32
    %66 = tpu.dynamic_rotate %65 by %c1_i32_20 dim 1 : vector<16x128xf32>, i32 -> vector<16x128xf32>
    %c1_i32_21 = arith.constant 1 : i32
    %67 = tpu.dynamic_rotate %66 by %c1_i32_21 dim 0 : vector<16x128xf32>, i32 -> vector<16x128xf32>
    %c0_i32_22 = arith.constant 0 : i32
    %68 = vector.broadcast %c0_i32_22 : i32 to vector<16x128xi32>
    %69 = arith.cmpi eq, %10, %68 : vector<16x128xi32>
    %70 = arith.select %69, %67, %66 : vector<16x128xi1>, vector<16x128xf32>
    %71 = arith.addf %7, %12 : f32
    %72 = vector.broadcast %71 : f32 to vector<1x1xf32>
    %73 = arith.subf %72, %8 : vector<1x1xf32>
    %cst_23 = arith.constant 1.000000e+00 : f32
    %74 = vector.broadcast %cst_23 : f32 to vector<1x1xf32>
    %75 = arith.maximumf %73, %74 : vector<1x1xf32>
    %76 = vector.broadcast %7 : f32 to vector<1x1xf32>
    %77 = arith.subf %76, %8 : vector<1x1xf32>
    %78 = arith.divf %77, %75 : vector<1x1xf32>
    %cst_24 = arith.constant 1.000000e+00 : f32
    %79 = vector.broadcast %cst_24 : f32 to vector<1x1xf32>
    %80 = arith.subf %79, %78 : vector<1x1xf32>
    %c0_i32_25 = arith.constant 0 : i32
    %81 = arith.cmpi eq, %arg0, %c0_i32_25 : i32
    %cst_26 = arith.constant 0.000000e+00 : f32
    %82 = vector.broadcast %cst_26 : f32 to vector<1x1xf32>
    %83 = arith.select %81, %82, %80 : vector<1x1xf32>
    %c0_i32_27 = arith.constant 0 : i32
    %84 = vector.broadcast %c0_i32_27 : i32 to vector<16x128xi32>
    %85 = arith.cmpi eq, %9, %84 : vector<16x128xi32>
    %c0_i32_28 = arith.constant 0 : i32
    %86 = vector.broadcast %c0_i32_28 : i32 to vector<16x128xi32>
    %87 = arith.cmpi eq, %10, %86 : vector<16x128xi32>
    %88 = arith.andi %85, %87 : vector<16x128xi1>
    %89 = vector.shape_cast %83 : vector<1x1xf32> to vector<1x1xf32>
    %90 = vector.broadcast %89 : vector<1x1xf32> to vector<16x128xf32>
    %91 = arith.select %88, %90, %70 : vector<16x128xi1>, vector<16x128xf32>
    %92 = arith.subf %65, %91 : vector<16x128xf32>
    %cst_29 = arith.constant 0.000000e+00 : f32
    %93 = vector.broadcast %cst_29 : f32 to vector<16x128xf32>
    %94 = arith.cmpf ogt, %3, %93 : vector<16x128xf32>
    %cst_30 = arith.constant 1.000000e+00 : f32
    %95 = vector.broadcast %cst_30 : f32 to vector<16x128xf32>
    %96 = arith.addf %3, %95 : vector<16x128xf32>
    %97 = math.exp %3 : vector<16x128xf32>
    %98 = arith.select %94, %96, %97 : vector<16x128xi1>, vector<16x128xf32>
    %c0_31 = arith.constant 0 : index
    %c0_32 = arith.constant 0 : index
    %99 = vector.load %arg5[%c0_31, %c0_32] : memref<1x1xf32, #tpu.memory_space<vmem>>, vector<1x1xf32>
    %100 = arith.mulf %98, %92 : vector<16x128xf32>
    %101 = vector.shape_cast %100 : vector<16x128xf32> to vector<1x16x128xf32>
    %cst_33 = arith.constant dense<0.000000e+00> : vector<1xf32>
    %102 = vector.multi_reduction <add>, %101, %cst_33 [1, 2] : vector<1x16x128xf32> to vector<1xf32>
    %103 = vector.shape_cast %102 : vector<1xf32> to vector<1x1x1xf32>
    %104 = vector.extract %103[0, 0, 0] : f32 from vector<1x1x1xf32>
    %105 = vector.broadcast %104 : f32 to vector<1x1xf32>
    %106 = arith.addf %99, %105 : vector<1x1xf32>
    %c0_34 = arith.constant 0 : index
    %c0_35 = arith.constant 0 : index
    %107 = vector.load %arg5[%c0_34, %c0_35] : memref<1x1xf32, #tpu.memory_space<vmem>>, vector<1x1xf32>
    tpu.vector_store %arg5[%c0_34, %c0_35], %106 {strides = array<i32>} : memref<1x1xf32, #tpu.memory_space<vmem>>, vector<1x1xf32>,
    %108 = vector.shape_cast %22 : vector<16x1xf32> to vector<1x16x1xf32>
    %cst_36 = arith.constant dense<0.000000e+00> : vector<1xf32>
    %109 = vector.multi_reduction <add>, %108, %cst_36 [1, 2] : vector<1x16x1xf32> to vector<1xf32>
    %110 = vector.shape_cast %109 : vector<1xf32> to vector<1x1x1xf32>
    %111 = vector.extract %110[0, 0, 0] : f32 from vector<1x1x1xf32>
    %112 = vector.broadcast %111 : f32 to vector<1x1xf32>
    %113 = arith.addf %8, %112 : vector<1x1xf32>
    %c0_37 = arith.constant 0 : index
    %c0_38 = arith.constant 0 : index
    %114 = vector.load %arg6[%c0_37, %c0_38] : memref<1x1xf32, #tpu.memory_space<vmem>>, vector<1x1xf32>
    tpu.vector_store %arg6[%c0_37, %c0_38], %113 {strides = array<i32>} : memref<1x1xf32, #tpu.memory_space<vmem>>, vector<1x1xf32>,
    return
  }
  func.func @transform_0(%arg0: i32, %arg1: memref<1xi32, #tpu.memory_space<smem>>) -> (i32, i32) {
    %c0_i32 = arith.constant 0 : i32
    %c0_i32_0 = arith.constant 0 : i32
    return %arg0, %c0_i32 : i32, i32
  }
  func.func @transform_1(%arg0: i32, %arg1: memref<1xi32, #tpu.memory_space<smem>>) -> (i32, i32) {
    %c0_i32 = arith.constant 0 : i32
    %c0_i32_0 = arith.constant 0 : i32
    return %arg0, %c0_i32 : i32, i32
  }
  func.func @transform_2(%arg0: i32, %arg1: memref<1xi32, #tpu.memory_space<smem>>) -> (i32, i32) {
    %c0_i32 = arith.constant 0 : i32
    %c0_i32_0 = arith.constant 0 : i32
    %c0_i32_1 = arith.constant 0 : i32
    return %c0_i32, %c0_i32_0 : i32, i32
  }
  func.func @transform_3(%arg0: i32, %arg1: memref<1xi32, #tpu.memory_space<smem>>) -> (i32, i32) {
    %c0_i32 = arith.constant 0 : i32
    %c0_i32_0 = arith.constant 0 : i32
    %c0_i32_1 = arith.constant 0 : i32
    return %c0_i32, %c0_i32_0 : i32, i32
  }
}

</mosaic_0001>

<bundles_post_ra>
// kernel: lovasz_loss.1
= control target key start
LH: loop header
LB: loop body
LE: loop exit
PB: predicated region body
PF: predicated region fallthrough
CT: control target
= control target key end

     0   :  { %v439_v1 = vmov 0.0   ;;  %vm440_vm0 = vmmov 0   ;;  %v441_v3 = vmov 127   ;;  %s567_s0 = inlined_call_operand.<no memory space> [shape: s32[1], index: 0, kind: input, shape index: {}]   ;;  %s568_s1 = inlined_call_operand.vmem [shape: f32[16,128], index: 1, kind: input, shape index: {}]   ;;  %s569_s2 = inlined_call_operand.vmem [shape: bf16[16,128], index: 2, kind: input, shape index: {}]   ;;  %s570_s3 = inlined_call_operand.vmem [shape: bf16[128,128], index: 3, kind: input, shape index: {}]   ;;  %s571_s4 = inlined_call_operand.hbm [shape: f32[1,1], index: 4, kind: output, shape index: {}]  }
   0x1   :  { %v398_v0 = vld [vmem:[%s570_s3] sm:$0xff]   ;;  %365 = vmatprep.subr.bf16.mxu0 %v439_v1  ;;  %v399_v2 = vld [vmem:[%s570_s3 + $0x8] sm:$0xff]   ;;  %381 = vmatprep.mubr.msk.bf16.mxu0 %vm440_vm0, %v439_v1  ;;  %v400_v4 = vld [vmem:[%s570_s3 + $0x10] sm:$0xff]  }
   0x2   :  { %366 = vmatpush3.bf16.msra.mxu0 %v398_v0  ;;  %395 = vset.pattern.permute.xlu0 %v441_v3 }
   0x3   :  { %367 = vmatprep.subr.bf16.mxu0 %v439_v1 }
   0x6   :  { %368 = vmatpush3.bf16.msra.mxu0 %v399_v2 }
   0x7   :  { %369 = vmatprep.subr.bf16.mxu0 %v439_v1 }
   0x8   :  { %10 = vsyncpa [#allocation6], 0  ;;  %v401_v5 = vld [vmem:[%s570_s3 + $0x18] sm:$0xff]   ;;  %v402_v6 = vld [vmem:[%s570_s3 + $0x20] sm:$0xff]   ;;  %vm22_vm1 = vcmask 0   ;;  %v48_v11 = vlaneseq  ;;  %v442_v12 = vmov 0   ;;  %s46_s7 = scvt.s32.f32 %s567_s0 }
   0x9   :  { %v403_v7 = vld [vmem:[%s570_s3 + $0x28] sm:$0xff]   ;;  %v404_v8 = vld [vmem:[%s570_s3 + $0x30] sm:$0xff]   ;;  %v405_v9 = vld [vmem:[%s570_s3 + $0x38] sm:$0xff]   ;;  %396 = vset.pattern.permute.xlu1 %v442_v12  ;;  %24 = vst.msk [vmem:[#allocation2] sm:$0x1] %vm22_vm1, %v439_v1  ;;  %s443_s0 = smov 1  }
   0xa   :  { %370 = vmatpush3.bf16.msra.mxu0 %v400_v4  ;;  %v406_v10 = vld [vmem:[%s569_s2] sm:$0xff]   ;;  %23 = vst.msk [vmem:[#allocation5] sm:$0x1] %vm22_vm1, %v439_v1  ;;  %v499_v13 = vshrl.u32 %v48_v11, 7  ;;  %v518_v32 = vand.u32 127, %v48_v11  ;;  %v225_v54 = vstv %s46_s7  ;;  %vm317_vm13 = vcmask 7168  }
   0xb   :  { %371 = vmatprep.subr.bf16.mxu0 %v439_v1 }
   0xc   :  { %v217_v14 = vsub.s32 0, %v499_v13  ;;  %vm173_vm2 = vcmp.lt.s32.totalorder %v499_v13, 1  ;;  %vm176_vm3 = vcmp.ge.s32.totalorder %v499_v13, 1  ;;  %v50_v28 = vadd.s32 8, %v499_v13 }
   0xd   :  { %v55_v33 = vmul.u32 128, %v499_v13  ;;  %vm184_vm4 = vcmp.lt.s32.totalorder %v499_v13, 2  ;;  %vm187_vm5 = vcmp.ge.s32.totalorder %v499_v13, 2  ;;  %vm195_vm6 = vcmp.lt.s32.totalorder %v499_v13, 4 }
   0xe   :  { %372 = vmatpush3.bf16.msra.mxu0 %v401_v5  ;;  %v275_v17 = vrot.slane %v439_v1, %v217_v14  ;;  %v56_v36 = vmul.u32 128, %v50_v28  ;;  %vm198_vm7 = vcmp.ge.s32.totalorder %v499_v13, 4  ;;  %vm252_vm8 = vcmp.eq.s32.totalorder %v518_v32, 0 }
   0xf   :  { %373 = vmatprep.subr.bf16.mxu0 %v439_v1  ;;  %v57_v39 = vadd.s32 %v55_v33, %v518_v32  ;;  %vm267_vm9 = vcmp.eq.s32.totalorder %v499_v13, 0 }
  0x10   :  { %v502_v15 = vld [vmem:[#allocation2] sm:$0x1]  ;;  %v58_v43 = vadd.s32 %v56_v36, %v518_v32  ;;  %vm269_vm12 = vmand %vm267_vm9, %vm252_vm8 }
  0x11   :  { %v218_v16 = vrot.slane %v502_v15, %v217_v14  ;;  %v59_v46 = vadd.s32 1, %v57_v39 }
  0x12   :  { %374 = vmatpush3.bf16.msra.mxu0 %v402_v6  ;;  %v60_v49 = vadd.s32 1, %v58_v43 }
  0x13   :  { %375 = vmatprep.subr.bf16.mxu0 %v439_v1  ;;  %220 = vperm.xlu1 %396, %v218_v16   ;;  %v61_v53 = vcvt.s32.f32 %v59_v46 }
  0x14   :  { %v62_v56 = vcvt.s32.f32 %v60_v49 }
  0x15   :  { %v228_v60 = vadd.f32 %v225_v54, %v61_v53 }
  0x16   :  { %376 = vmatpush3.bf16.msra.mxu0 %v403_v7  ;;  %v229_v63 = vadd.f32 %v225_v54, %v62_v56 }
  0x17   :  { %377 = vmatprep.subr.bf16.mxu0 %v439_v1  ;;  %277 = vperm.xlu1 %396, %v275_v17  }
  0x1a   :  { %378 = vmatpush3.bf16.msra.mxu0 %v404_v8 }
  0x1b   :  { %379 = vmatprep.subr.bf16.mxu0 %v439_v1 }
  0x1e   :  { %380 = vmatpush3.bf16.msra.mxu0 %v405_v9 }
  0x21   :  { %382 = vmatmul.mubr.bf16.vlgmr.msra.gmra.mrb[0].mxu0 %v406_v10 }
  0x92   :  { %v221_v61 = vpop.permute.xlu1 %220 }
  0xf4   :  { %v505_v18 = vpop.f32.mrb[0].mxu0 }
  0xf5   :  { %163 = vperm.xlu0 %395, %v505_v18   ;;  %v383_v19 = vpop.f32.mrb[1].mxu0 }
  0xf6   :  { %v508_v20 = vpop.f32.mrb[2].mxu0 }
  0xf7   :  { %v384_v21 = vpop.f32.mrb[3].mxu0 }
  0xf9   :  { %168 = vperm.xlu0 %395, %v508_v20  }
  0xfd   :  { %397 = vset.pattern.permute.xlu0 %v442_v12 }
 0x174   :  { %v164_v22 = vpop.permute.xlu0 %163 }
 0x175   :  { %v171_v24 = vrot.slane %v164_v22, 7 }
 0x178   :  { %v169_v23 = vpop.permute.xlu0 %168 }
 0x179   :  { %v172_v25 = vrot.slane %v169_v23, 7 }
 0x17b   :  { %v174_v26 = vsel %vm173_vm2, %v171_v24, %v172_v25  ;;  %v175_v27 = vsel %vm173_vm2, %v172_v25, %v171_v24 }
 0x17c   :  { %v178_v29 = vsel %vm176_vm3, %v175_v27, 0.0  ;;  %v181_v30 = vadd.f32 %v174_v26, %v169_v23  ;;  %v278_v26 = vpop.permute.xlu1 %277 }
 0x17d   :  { %v180_v31 = vadd.f32 %v178_v29, %v164_v22 }
 0x17e   :  { %v183_v34 = vrot.slane %v181_v30, 6 }
 0x17f   :  { %v182_v35 = vrot.slane %v180_v31, 6 }
 0x181   :  { %v185_v37 = vsel %vm184_vm4, %v182_v35, %v183_v34  ;;  %v186_v38 = vsel %vm184_vm4, %v183_v34, %v182_v35 }
 0x182   :  { %v189_v40 = vsel %vm187_vm5, %v186_v38, 0.0  ;;  %v192_v41 = vadd.f32 %v185_v37, %v181_v30 }
 0x183   :  { %v191_v42 = vadd.f32 %v189_v40, %v180_v31 }
 0x184   :  { %v194_v44 = vrot.slane %v192_v41, 4 }
 0x185   :  { %v193_v45 = vrot.slane %v191_v42, 4 }
 0x187   :  { %v196_v47 = vsel %vm195_vm6, %v193_v45, %v194_v44  ;;  %v197_v48 = vsel %vm195_vm6, %v194_v44, %v193_v45 }
 0x188   :  { %v200_v50 = vsel %vm198_vm7, %v197_v48, 0.0  ;;  %v203_v51 = vadd.f32 %v196_v47, %v192_v41 }
 0x189   :  { %v202_v52 = vadd.f32 %v200_v50, %v191_v42 }
 0x18b   :  { %v209_v55 = vadd.f32 %v203_v51, %v202_v52  ;;  %v210_v57 = vsub.f32 %v202_v52, %v164_v22  ;;  %v26_v22 = vld [vmem:[%s568_s1 + $0x8] sm:$0xff] }
 0x18c   :  { %v290_v24 = vmul.f32 1.442695, %v26_v22  ;;  %v287_v29 = vadd.f32 1.0, %v26_v22  ;;  %vm285_vm11 = vcmp.gt.f32.partialorder %v26_v22, 0.0 }
 0x18d   :  { %v211_v58 = vsub.f32 %v209_v55, %v169_v23  ;;  %v212_v59 = vadd.f32 %v210_v57, %v505_v18  ;;  %v25_v23 = vld [vmem:[%s568_s1] sm:$0xff]  ;;  %s444_s1 = smov [#allocation5]  }
 0x18e   :  { %v288_v25 = vmul.f32 1.442695, %v25_v23  ;;  %v286_v28 = vadd.f32 1.0, %v25_v23  ;;  %vm284_vm10 = vcmp.gt.f32.partialorder %v25_v23, 0.0  ;;  %s339_s12 = sshll.u32 %s444_s1, 4  ;;  %s340_s12 = int_to_ptr.vmem [resolvable:$true] %s339_s12 }
 0x18f   :  { %v213_v62 = vadd.f32 %v211_v58, %v508_v20  ;;  %v223_v0 = vadd.f32 %v221_v61, %v212_v59  ;;  %s415_s15 = scalar_lea.vmem %s340_s12, 16  ;;  %s419_s16 = scalar_lea.vmem %s340_s12, 32 }
 0x190   :  { %p416_p0 = scmp.ne.s32.totalorder %s340_s12, %s415_s15  ;;  %p420_p1 = scmp.lt.s32.totalorder %s340_s12, %s340_s12 }
 0x191   :  { %v224_v1 = vadd.f32 %v221_v61, %v213_v62  ;;  %v230_v2 = vsub.f32 %v228_v60, %v223_v0  ;;  %v226_v9 = vsub.f32 %v225_v54, %v223_v0  ;;  %p421_p2 = scmp.lt.s32.totalorder %s419_s16, %s415_s15 }
 0x193   :  { %v231_v3 = vsub.f32 %v229_v63, %v224_v1  ;;  %407 = vrcp.f32 %v230_v2  ;;  %v227_v12 = vsub.f32 %v225_v54, %v224_v1  ;;  %v294_v63 = vld [vmem:[#allocation5] sm:$0x1]  ;;  %p422_p3 = por %p421_p2, %p420_p1 }
 0x195   :  { %409 = vrcp.f32 %v231_v3  ;;  %p423_p4 = pnand %p422_p3, %p416_p0 }
 0x196   :  { %411 = vpow2.f32 %v290_v24 }
 0x197   :  { %413 = vpow2.f32 %v288_v25 }
 0x19d   :  { %v408_v4 = vpop.eup %407 }
 0x19e   :  { %v234_v5 = vmul.f32 %v408_v4, %v230_v2 }
 0x19f   :  { %v410_v6 = vpop.eup %409 }
 0x1a0   :  { %v235_v7 = vmul.f32 %v410_v6, %v231_v3  ;;  %v236_v8 = vsub.f32 2.0, %v234_v5 }
 0x1a2   :  { %v237_v10 = vsub.f32 2.0, %v235_v7  ;;  %v238_v11 = vmul.f32 %v408_v4, %v236_v8 }
 0x1a4   :  { %v240_v14 = vmul.f32 %v238_v11, %v226_v9  ;;  %v239_v16 = vmul.f32 %v410_v6, %v237_v10 }
 0x1a6   :  { %v242_v17 = vsub.f32 1.0, %v240_v14  ;;  %v241_v19 = vmul.f32 %v239_v16, %v227_v12 }
 0x1a8   :  { %244 = vrot.lane.b32.xlu0 %v242_v17, %s443_s0  ;;  %v243_v21 = vsub.f32 1.0, %v241_v19 }
 0x1aa   :  { %246 = vrot.lane.b32.xlu1 %v243_v21, %s443_s0 }
 0x1ac   :  { %311 = vrot.lane.b32.xlu0 %v505_v18, %s443_s0  ;;  %v412_v18 = vpop.eup %411 }
 0x1ad   :  { %v414_v30 = vpop.eup %413  ;;  %v293_v41 = vsel %vm285_vm11, %v287_v29, %v412_v18 }
 0x1ae   :  { %313 = vrot.lane.b32.xlu1 %v508_v20, %s443_s0  ;;  %v292_v40 = vsel %vm284_vm10, %v286_v28, %v414_v30 }
 0x21a   :  { %v245_v27 = vpop.permute.xlu0 %244 }
 0x21b   :  { %v248_v31 = vrot.slane %v245_v27, 7 }
 0x21c   :  { %v247_v20 = vpop.permute.xlu1 %246 }
 0x21d   :  { %v249_v33 = vrot.slane %v247_v20, 7 }
 0x21e   :  { %v312_v34 = vpop.permute.xlu0 %311 }
 0x21f   :  { %v250_v35 = vsel %vm173_vm2, %v248_v31, %v249_v33  ;;  %v251_v36 = vsel %vm173_vm2, %v249_v33, %v248_v31  ;;  %v318_v43 = vsel %vm317_vm13, %v312_v34, 0.0 }
 0x220   :  { %v253_v37 = vsel %vm252_vm8, %v251_v36, %v245_v27  ;;  %v254_v38 = vsel %vm252_vm8, %v250_v35, %v247_v20  ;;  %v314_v39 = vpop.permute.xlu1 %313 }
 0x221   :  { %v283_v42 = vsub.f32 %v243_v21, %v254_v38  ;;  %v319_v44 = vsel %vm317_vm13, %v314_v39, 0.0  ;;  %v280_v45 = vsel %vm269_vm12, %v278_v26, %v253_v37 }
 0x222   :  { %v320_v46 = vadd.f32 %v319_v44, %v318_v43  ;;  %v282_v47 = vsub.f32 %v242_v17, %v280_v45 }
 0x223   :  { %v296_v48 = vmul.f32 %v293_v41, %v283_v42 }
 0x224   :  { %321 = vadd.xlane.f32.xlu1 %v320_v46  ;;  %v295_v49 = vmul.f32 %v292_v40, %v282_v47 }
 0x226   :  { %v297_v13 = vadd.f32 %v296_v48, %v295_v49 }
 0x228   :  { %298 = vadd.xlane.f32.xlu0 %v297_v13 }
 0x2b1   :  { %v322_v50 = vpop.xlane.xlu1 %321 }
 0x2b2   :  { %v323_v51 = vrot.slane %v322_v50, 4 }
 0x2b4   :  { %v324_v52 = vadd.f32 %v323_v51, %v322_v50 }
 0x2b5   :  { %v299_v53 = vpop.xlane.xlu0 %298 }
 0x2b6   :  { %v325_v32 = vrot.slane %v324_v52, 2  ;;  %v300_v54 = vrot.slane %v299_v53, 4 }
 0x2b8   :  { %v301_v55 = vadd.f32 %v300_v54, %v299_v53  ;;  %v326_v56 = vadd.f32 %v325_v32, %v324_v52 }
 0x2ba   :  { %v302_v57 = vrot.slane %v301_v55, 2  ;;  %v327_v59 = vrot.slane %v326_v56, 1 }
 0x2bc   :  { %v303_v58 = vadd.f32 %v302_v57, %v301_v55  ;;  %v328_v62 = vadd.f32 %v327_v59, %v326_v56 }
 0x2be   :  { %v304_v60 = vrot.slane %v303_v58, 1 }
 0x2c0   :  { %v305_v61 = vadd.f32 %v304_v60, %v303_v58 }
 0x2c2   :  { %385 = vpush %v305_v61 }
 0x2c3   :  { %387 = vpush %v328_v62 }
 0x2f3   :  { %s386_s13 = spop %385 }
 0x2f4   :  { %v307_v0 = vstv %s386_s13  ;;  %s388_s14 = spop %387 }
 0x2f5   :  { %v308_v1 = vadd.f32 %v307_v0, %v294_v63  ;;  %v330_v2 = vstv %s388_s14 }
 0x2f6   :  { %v331_v3 = vadd.f32 %v330_v2, %v502_v15 }
 0x2f7   :  { %310 = vst.msk [vmem:[#allocation5] sm:$0x1] %vm22_vm1, %v308_v1 }
 0x2f8   :  { %332 = vst.msk [vmem:[#allocation2] sm:$0x1] %vm22_vm1, %v331_v3 }
 0x2f9   :  { %426 = shalt.err (!%p423_p4)
}
 0x2fa   :  { %s427_s19 = scalar_lea.hbm %s571_s4, 16 }
 0x2fb   :  { %p428_p5 = scmp.ne.s32.totalorder %s571_s4, %s427_s19  ;;  %p431_p6 = scmp.lt.u32.totalorder %s427_s19, %s571_s4 }
 0x2fd   :  { %p433_p7 = pnand %p431_p6, %p428_p5 }
 0x2ff   :  { %436 = shalt.err (!%p433_p7)
}
 0x300   :  { %342 = dma.vmem_to_hbm [thread:$0]  %s340_s12, 16, %s571_s4, [#allocation6]  }
 0x301   :  { %437 = dma.done.wait [#allocation6], 16  }
 0x302   :  { %438 = vsyncadd [#allocation6], 4294967280 }
 0x303   :  { %346 = vsyncpa [#allocation6], 1 }

</bundles_post_ra>
